<compile_context>
chip_gen: v6e
topology: v6e:2x2x1
jax: 0.10.0
libtpu: 0.0.40
codegen_flags: <defaults>
</compile_context>

<pallas_src>
import math
import functools

import jax
import jax.numpy as jnp
from jax.experimental import pallas as pl
from jax.experimental.pallas import tpu as pltpu

LANE = 128
SUBLANE = 8


def _round_up(x, n):
    return ((x + n - 1) // n) * n


def _mse_kernel(x_ref, y_ref, o_ref, acc_ref, *,
                tile_rows, valid_rows, blocks_per_split):
    s = pl.program_id(0)   # TensorCore split (parallel axis)
    i = pl.program_id(1)   # reduction step within this split (arbitrary axis)

    # Init the vector accumulator at the start of each split's reduction.
    @pl.when(i == 0)
    def _():
        acc_ref[...] = jnp.zeros_like(acc_ref)

    # Elementwise squared difference in f32 (cast is free on the VPU).
    d = x_ref[...].astype(jnp.float32) - y_ref[...].astype(jnp.float32)
    sq = d * d

    # Unclamped global block index / row base (used for tail masking; the
    # index_map clamps the DMA so OOB splits re-read a valid block, which we
    # then mask to zero here).
    gb = s * blocks_per_split + i
    base_row = gb * tile_rows
    fully_valid = base_row + tile_rows <= valid_rows

    # Fast path: whole block valid -> pure VPU accumulation into (8, 128).
    @pl.when(fully_valid)
    def _():
        acc_ref[...] += jnp.sum(sq.reshape(tile_rows // SUBLANE, SUBLANE, LANE),
                                axis=0)

    # Slow path (only the ragged / duplicated tail blocks): mask invalid rows.
    @pl.when(jnp.logical_not(fully_valid))
    def _():
        row = base_row + jax.lax.broadcasted_iota(jnp.int32, (tile_rows, 1), 0)
        masked = jnp.where(row < valid_rows, sq, 0.0)
        acc_ref[...] += jnp.sum(
            masked.reshape(tile_rows // SUBLANE, SUBLANE, LANE), axis=0)

    # Write this split's partial-sum tile once, on its last reduction step.
    @pl.when(i == blocks_per_split - 1)
    def _():
        o_ref[...] = acc_ref[...]


def mse_loss(inputs, targets, *, tile_rows=2048, num_splits=2):
    assert inputs.shape == targets.shape, (inputs.shape, targets.shape)
    total = math.prod(inputs.shape)

    # Flatten to a lane-dense (M, 128) slab in native dtype.  This is a pure
    # reshape (no copy) whenever total % 128 == 0; otherwise only a tiny
    # zero-pad to the next lane multiple is needed (zeros on both operands
    # contribute nothing to the squared-difference sum).
    x = jnp.ravel(inputs)
    y = jnp.ravel(targets)
    lane_pad = (-total) % LANE
    if lane_pad:
        x = jnp.pad(x, (0, lane_pad))
        y = jnp.pad(y, (0, lane_pad))
    m = (total + lane_pad) // LANE
    x = x.reshape(m, LANE)
    y = y.reshape(m, LANE)

    # Row tile: as large as requested but no larger than needed, multiple of 8.
    tile_rows = _round_up(tile_rows, SUBLANE)
    tile_rows = max(SUBLANE, min(tile_rows, _round_up(m, SUBLANE)))

    nblocks = pl.cdiv(m, tile_rows)
    num_splits = max(1, min(num_splits, nblocks))
    blocks_per_split = pl.cdiv(nblocks, num_splits)

    def in_index(s, i):
        # Clamp so the DMA never targets a block index past the array; the
        # kernel masks any clamped / partial block against the true row count.
        return (jnp.minimum(s * blocks_per_split + i, nblocks - 1), 0)

    kernel = functools.partial(
        _mse_kernel,
        tile_rows=tile_rows,
        valid_rows=m,
        blocks_per_split=blocks_per_split,
    )

    partials = pl.pallas_call(
        kernel,
        out_shape=jax.ShapeDtypeStruct((num_splits * SUBLANE, LANE),
                                       jnp.float32),
        grid_spec=pltpu.PrefetchScalarGridSpec(
            num_scalar_prefetch=0,
            grid=(num_splits, blocks_per_split),
            in_specs=[
                pl.BlockSpec((tile_rows, LANE), in_index),
                pl.BlockSpec((tile_rows, LANE), in_index),
            ],
            out_specs=pl.BlockSpec((SUBLANE, LANE), lambda s, i: (s, 0)),
            scratch_shapes=[pltpu.VMEM((SUBLANE, LANE), jnp.float32)],
        ),
        compiler_params=pltpu.CompilerParams(
            dimension_semantics=("parallel", "arbitrary"),
        ),
    )(x, y)

    # Tiny final reduce of the per-split partial-sum tiles, then the mean.
    return jnp.sum(partials) / total


if __name__ == "__main__":
    key = jax.random.PRNGKey(0)
    k1, k2 = jax.random.split(key)
    # Small NCHW tensors consistent with the PyTorch call site.
    inputs = jax.random.normal(k1, (2, 4, 16, 16), dtype=jnp.float32)
    targets = jax.random.normal(k2, (2, 4, 16, 16), dtype=jnp.float32)

    loss = mse_loss(inputs, targets)
    jax.block_until_ready(loss)

    ref = jnp.mean((inputs - targets) ** 2)
    assert jnp.allclose(loss, ref, rtol=1e-6, atol=1e-6), (loss, ref)
    print("KERNEL_OK")
</pallas_src>

<mosaic_0001>
module attributes {stable_mosaic.version = 11 : i64} {
  func.func @_mse_kernel(%arg0: i32, %arg1: i32, %arg2: memref<16x128xf32, #tpu.memory_space<vmem>>, %arg3: memref<16x128xf32, #tpu.memory_space<vmem>>, %arg4: memref<8x128xf32, #tpu.memory_space<vmem>>, %arg5: memref<8x128xf32, #tpu.memory_space<vmem>>) attributes {dimension_semantics = [#tpu.dimension_semantics<parallel>, #tpu.dimension_semantics<arbitrary>], iteration_bounds = array<i64: 1, 1>, scalar_prefetch = 0 : i64, scratch_operands = 1 : i64, tpu.core_type = #tpu.core_type<tc>, window_params = [{transform_indices = @transform_0, window_bounds = array<i64: 16, 128>}, {transform_indices = @transform_1, window_bounds = array<i64: 16, 128>}, {transform_indices = @transform_2, window_bounds = array<i64: 8, 128>}]} {
    %c0_i32 = arith.constant 0 : i32
    %0 = arith.cmpi eq, %arg1, %c0_i32 : i32
    %1 = arith.extui %0 : i1 to i32
    %c0_i32_0 = arith.constant 0 : i32
    %2 = arith.cmpi ne, %1, %c0_i32_0 : i32
    scf.if %2 {
      %cst = arith.constant 0.000000e+00 : f32
      %20 = vector.broadcast %cst : f32 to vector<8x128xf32>
      %c0_10 = arith.constant 0 : index
      %c0_11 = arith.constant 0 : index
      %21 = vector.load %arg5[%c0_10, %c0_11] : memref<8x128xf32, #tpu.memory_space<vmem>>, vector<8x128xf32>
      tpu.vector_store %arg5[%c0_10, %c0_11], %20 {strides = array<i32>} : memref<8x128xf32, #tpu.memory_space<vmem>>, vector<8x128xf32>,
    } else {
    }
    %c0 = arith.constant 0 : index
    %c0_1 = arith.constant 0 : index
    %3 = vector.load %arg2[%c0, %c0_1] : memref<16x128xf32, #tpu.memory_space<vmem>>, vector<16x128xf32>
    %c0_2 = arith.constant 0 : index
    %c0_3 = arith.constant 0 : index
    %4 = vector.load %arg3[%c0_2, %c0_3] : memref<16x128xf32, #tpu.memory_space<vmem>>, vector<16x128xf32>
    %5 = arith.subf %3, %4 : vector<16x128xf32>
    %6 = arith.mulf %5, %5 : vector<16x128xf32>
    %c1_i32 = arith.constant 1 : i32
    %7 = arith.muli %arg0, %c1_i32 : i32
    %8 = arith.addi %7, %arg1 : i32
    %c16_i32 = arith.constant 16 : i32
    %9 = arith.muli %8, %c16_i32 : i32
    %c16_i32_4 = arith.constant 16 : i32
    %10 = arith.addi %9, %c16_i32_4 : i32
    %c16_i32_5 = arith.constant 16 : i32
    %11 = arith.cmpi sle, %10, %c16_i32_5 : i32
    %12 = arith.extui %11 : i1 to i32
    %c0_i32_6 = arith.constant 0 : i32
    %13 = arith.cmpi ne, %12, %c0_i32_6 : i32
    scf.if %13 {
      %c0_10 = arith.constant 0 : index
      %c0_11 = arith.constant 0 : index
      %20 = vector.load %arg5[%c0_10, %c0_11] : memref<8x128xf32, #tpu.memory_space<vmem>>, vector<8x128xf32>
      %21 = vector.shape_cast %6 : vector<16x128xf32> to vector<2x8x128xf32>
      %cst = arith.constant dense<0.000000e+00> : vector<8x128xf32>
      %22 = vector.multi_reduction <add>, %21, %cst [0] : vector<2x8x128xf32> to vector<8x128xf32>
      %23 = arith.addf %20, %22 : vector<8x128xf32>
      %c0_12 = arith.constant 0 : index
      %c0_13 = arith.constant 0 : index
      %24 = vector.load %arg5[%c0_12, %c0_13] : memref<8x128xf32, #tpu.memory_space<vmem>>, vector<8x128xf32>
      tpu.vector_store %arg5[%c0_12, %c0_13], %23 {strides = array<i32>} : memref<8x128xf32, #tpu.memory_space<vmem>>, vector<8x128xf32>,
    } else {
    }
    %true = arith.constant true
    %14 = arith.xori %11, %true : i1
    %15 = arith.extui %14 : i1 to i32
    %c0_i32_7 = arith.constant 0 : i32
    %16 = arith.cmpi ne, %15, %c0_i32_7 : i32
    scf.if %16 {
      %20 = tpu.iota {dimensions = array<i32: 0>} : vector<16x1xi32>
      %21 = vector.broadcast %9 : i32 to vector<16x1xi32>
      %22 = arith.addi %21, %20 : vector<16x1xi32>
      %c16_i32_10 = arith.constant 16 : i32
      %23 = vector.broadcast %c16_i32_10 : i32 to vector<16x1xi32>
      %24 = arith.cmpi slt, %22, %23 : vector<16x1xi32>
      %cst = arith.constant 0.000000e+00 : f32
      %25 = vector.shape_cast %24 : vector<16x1xi1> to vector<16x1xi1>
      %26 = vector.broadcast %25 : vector<16x1xi1> to vector<16x128xi1>
      %27 = vector.broadcast %cst : f32 to vector<16x128xf32>
      %28 = arith.select %26, %6, %27 : vector<16x128xi1>, vector<16x128xf32>
      %c0_11 = arith.constant 0 : index
      %c0_12 = arith.constant 0 : index
      %29 = vector.load %arg5[%c0_11, %c0_12] : memref<8x128xf32, #tpu.memory_space<vmem>>, vector<8x128xf32>
      %30 = vector.shape_cast %28 : vector<16x128xf32> to vector<2x8x128xf32>
      %cst_13 = arith.constant dense<0.000000e+00> : vector<8x128xf32>
      %31 = vector.multi_reduction <add>, %30, %cst_13 [0] : vector<2x8x128xf32> to vector<8x128xf32>
      %32 = arith.addf %29, %31 : vector<8x128xf32>
      %c0_14 = arith.constant 0 : index
      %c0_15 = arith.constant 0 : index
      %33 = vector.load %arg5[%c0_14, %c0_15] : memref<8x128xf32, #tpu.memory_space<vmem>>, vector<8x128xf32>
      tpu.vector_store %arg5[%c0_14, %c0_15], %32 {strides = array<i32>} : memref<8x128xf32, #tpu.memory_space<vmem>>, vector<8x128xf32>,
    } else {
    }
    %c0_i32_8 = arith.constant 0 : i32
    %17 = arith.cmpi eq, %arg1, %c0_i32_8 : i32
    %18 = arith.extui %17 : i1 to i32
    %c0_i32_9 = arith.constant 0 : i32
    %19 = arith.cmpi ne, %18, %c0_i32_9 : i32
    scf.if %19 {
      %c0_10 = arith.constant 0 : index
      %c0_11 = arith.constant 0 : index
      %20 = vector.load %arg5[%c0_10, %c0_11] : memref<8x128xf32, #tpu.memory_space<vmem>>, vector<8x128xf32>
      %c0_12 = arith.constant 0 : index
      %c0_13 = arith.constant 0 : index
      %21 = vector.load %arg4[%c0_12, %c0_13] : memref<8x128xf32, #tpu.memory_space<vmem>>, vector<8x128xf32>
      tpu.vector_store %arg4[%c0_12, %c0_13], %20 {strides = array<i32>} : memref<8x128xf32, #tpu.memory_space<vmem>>, vector<8x128xf32>,
    } else {
    }
    return
  }
  func.func @transform_0(%arg0: i32, %arg1: i32) -> (i32, i32) {
    %c1_i32 = arith.constant 1 : i32
    %0 = arith.muli %arg0, %c1_i32 : i32
    %1 = arith.addi %0, %arg1 : i32
    %c0_i32 = arith.constant 0 : i32
    %2 = arith.minsi %1, %c0_i32 : i32
    %c0_i32_0 = arith.constant 0 : i32
    %c0_i32_1 = arith.constant 0 : i32
    return %2, %c0_i32_0 : i32, i32
  }
  func.func @transform_1(%arg0: i32, %arg1: i32) -> (i32, i32) {
    %c1_i32 = arith.constant 1 : i32
    %0 = arith.muli %arg0, %c1_i32 : i32
    %1 = arith.addi %0, %arg1 : i32
    %c0_i32 = arith.constant 0 : i32
    %2 = arith.minsi %1, %c0_i32 : i32
    %c0_i32_0 = arith.constant 0 : i32
    %c0_i32_1 = arith.constant 0 : i32
    return %2, %c0_i32_0 : i32, i32
  }
  func.func @transform_2(%arg0: i32, %arg1: i32) -> (i32, i32) {
    %c0_i32 = arith.constant 0 : i32
    %c0_i32_0 = arith.constant 0 : i32
    return %arg0, %c0_i32 : i32, i32
  }
}

</mosaic_0001>

<bundles_post_ra>
// kernel: tpu_custom_call.1
= control target key start
LH: loop header
LB: loop body
LE: loop exit
PB: predicated region body
PF: predicated region fallthrough
CT: control target
= control target key end

     0   :  { %7 = vsyncpa [#allocation4], 0  ;;  %s231_s0 = inlined_call_operand.hbm [shape: f32[16,128], index: 0, kind: input, shape index: {}]   ;;  %s232_s1 = inlined_call_operand.hbm [shape: f32[16,128], index: 1, kind: input, shape index: {}]   ;;  %s233_s2 = inlined_call_operand.hbm [shape: f32[8,128], index: 2, kind: output, shape index: {}]  }
   0x1   :  { %8 = vsyncpa [#allocation7], 0 }
   0x2   :  { %9 = vsyncpa [#allocation5], 0  ;;  %s202_s9 = smov [#allocation3]  }
   0x3   :  { %s21_s10 = sshll.u32 %s202_s9, 4  ;;  %s22_s10 = int_to_ptr.vmem [resolvable:$true] %s21_s10 }
   0x4   :  { %s144_s11 = scalar_lea.vmem %s22_s10, 256  ;;  %p149_p1 = scmp.lt.s32.totalorder %s22_s10, %s22_s10 }
   0x5   :  { %p145_p0 = scmp.ne.s32.totalorder %s22_s10, %s144_s11  ;;  %p150_p2 = scmp.lt.s32.totalorder %s144_s11, %s144_s11 }
   0x7   :  { %p151_p3 = por %p150_p2, %p149_p1 }
   0x9   :  { %p152_p4 = pnand %p151_p3, %p145_p0 }
   0xb   :  { %155 = shalt.err (!%p152_p4)
}
   0xc   :  { %s203_s12 = smov 128   ;;  %s204_s13 = smov 8  }
   0xd   :  { %27 = dma.hbm_to_vmem [thread:$0]  %s231_s0, 256, %s22_s10, [#allocation4], %s203_s12, %s203_s12, %s204_s13  }
   0xe   :  { %s205_s16 = smov [#allocation6]  }
   0xf   :  { %s39_s17 = sshll.u32 %s205_s16, 4  ;;  %s40_s17 = int_to_ptr.vmem [resolvable:$true] %s39_s17 }
  0x10   :  { %s164_s18 = scalar_lea.vmem %s40_s17, 256  ;;  %p169_p6 = scmp.lt.s32.totalorder %s40_s17, %s40_s17 }
  0x11   :  { %p165_p5 = scmp.ne.s32.totalorder %s40_s17, %s164_s18  ;;  %p170_p7 = scmp.lt.s32.totalorder %s164_s18, %s164_s18 }
  0x13   :  { %p171_p8 = por %p170_p7, %p169_p6 }
  0x15   :  { %p172_p9 = pnand %p171_p8, %p165_p5 }
  0x17   :  { %175 = shalt.err (!%p172_p9)
}
  0x18   :  { %45 = dma.hbm_to_vmem [thread:$0]  %s232_s1, 256, %s40_s17, [#allocation7], %s203_s12, %s203_s12, %s204_s13  }
  0x19   :  { %196 = dma.done.wait [#allocation4], 256  }
  0x1a   :  { %197 = vsyncadd [#allocation4], 4294967040 }
  0x1b   :  { %198 = dma.done.wait [#allocation7], 256  }
  0x1c   :  { %199 = vsyncadd [#allocation7], 4294967040  ;;  %v65_v0 = vld [vmem:[#allocation3] sm:$0xff]  ;;  %v66_v1 = vld [vmem:[#allocation3 + $0x8] sm:$0xff]  ;;  %s206_s0 = smov [#allocation8]  }
  0x1d   :  { %v67_v2 = vld [vmem:[#allocation6] sm:$0xff]  ;;  %v68_v3 = vld [vmem:[#allocation6 + $0x8] sm:$0xff]  ;;  %s117_s21 = sshll.u32 %s206_s0, 4  ;;  %s118_s21 = int_to_ptr.vmem [resolvable:$true] %s117_s21 }
  0x1e   :  { %v69_v4 = vsub.f32 %v65_v0, %v67_v2  ;;  %v70_v5 = vsub.f32 %v66_v1, %v68_v3  ;;  %s176_s22 = scalar_lea.vmem %s118_s21, 128  ;;  %p181_p11 = scmp.lt.s32.totalorder %s118_s21, %s118_s21 }
  0x1f   :  { %p177_p10 = scmp.ne.s32.totalorder %s118_s21, %s176_s22  ;;  %p182_p12 = scmp.lt.s32.totalorder %s176_s22, %s176_s22 }
  0x20   :  { %v71_v6 = vmul.f32 %v69_v4, %v69_v4  ;;  %v72_v7 = vmul.f32 %v70_v5, %v70_v5 }
  0x21   :  { %p183_p13 = por %p182_p12, %p181_p11 }
  0x22   :  { %v81_v8 = vadd.f32 %v72_v7, %v71_v6 }
  0x23   :  { %p184_p0 = pnand %p183_p13, %p177_p10 }
  0x24   :  { %110 = vst [vmem:[#allocation8] sm:$0xff] %v81_v8 }
  0x25   :  { %187 = shalt.err (!%p184_p0)
}
  0x26   :  { %120 = dma.vmem_to_hbm [thread:$0]  %s118_s21, 128, %s233_s2, [#allocation5]  }
  0x27   :  { %200 = dma.done.wait [#allocation5], 128  }
  0x28   :  { %201 = vsyncadd [#allocation5], 4294967168 }
  0x29   :  { %124 = vsyncpa [#allocation4], 1 }
  0x2a   :  { %125 = vsyncpa [#allocation7], 1 }
  0x2b   :  { %126 = vsyncpa [#allocation5], 1 }

</bundles_post_ra>
